<compile_context>
chip_gen: v6e
topology: v6e:2x2x1
jax: 0.10.0
libtpu: 0.0.40
codegen_flags: <defaults>
</compile_context>

<pallas_src>
import functools

import jax
import jax.numpy as jnp
from jax import lax
from jax.experimental import pallas as pl
from jax.experimental.pallas import tpu as pltpu

_DEFAULT_VMEM_LIMIT = 48 * 1024 * 1024  # safe on v7x (64 MiB physical)


# ----------------------------------------------------------------------------
# Generic batched tiled matmul with fused epilogue
#   out[b] = a[b] @ B (+ self_add[b] row-tile) (+ bias) (l2-normalize rows)
# ----------------------------------------------------------------------------
def _mm_kernel(*refs, has_self, has_bias, normalize):
    a_ref, b_ref = refs[0], refs[1]
    idx = 2
    self_ref = None
    bias_ref = None
    if has_self:
        self_ref = refs[idx]; idx += 1
    if has_bias:
        bias_ref = refs[idx]; idx += 1
    out_ref = refs[idx]
    acc_ref = refs[idx + 1]

    k = pl.program_id(2)

    @pl.when(k == 0)
    def _init():
        acc_ref[...] = jnp.zeros_like(acc_ref)

    # MXU matmul with f32 accumulation (operands may be bf16/f32; jnp promotes).
    acc_ref[...] += jnp.dot(a_ref[...], b_ref[...],
                            preferred_element_type=jnp.float32)

    @pl.when(k == pl.num_programs(2) - 1)
    def _finalize():
        y = acc_ref[...]
        if has_self:
            y = y + self_ref[...].astype(jnp.float32)
        if has_bias:
            y = y + bias_ref[...].astype(jnp.float32)
        if normalize:
            # F.normalize(y, p=2, dim=-1): y / max(||y||, 1e-12)
            #   == y * rsqrt(max(sum(y*y), 1e-24))   (rsqrt rides the EUP slot)
            sumsq = jnp.sum(y * y, axis=-1, keepdims=True)
            y = y * lax.rsqrt(jnp.maximum(sumsq, 1e-24))
        out_ref[...] = y.astype(out_ref.dtype)


def _block_size(dim, target, align):
    """Largest multiple of `align` that divides `dim` and is <= `target`.

    Falls back to the full dim (block == full array dim is always legal)."""
    if dim <= target:
        return dim
    cand = (target // align) * align
    while cand >= align:
        if dim % cand == 0:
            return cand
        cand -= align
    return dim


def _fused_matmul(a, b, *, self_add=None, bias=None, normalize=False,
                  block_m=None, block_k=None, out_dtype=jnp.float32,
                  vmem_limit_bytes=_DEFAULT_VMEM_LIMIT):
    """a: (B, M, K); b: (K, N2) shared or (B, K, N2) batched.

    Optional fused epilogue: + self_add[b, row-tile] (same (B, M, N2) layout
    as the output), + bias (N2,), row-wise L2 normalize.  Returns (B, M, N2).
    """
    B, M, K = a.shape
    if b.ndim == 2:
        K2, N2 = b.shape
    else:
        _, K2, N2 = b.shape
    assert K == K2, (K, K2)

    # Row tile: sublane dim -> multiple of 8 (or full).  Contraction tile:
    # lane dim of `a` -> multiple of 128 (or full); 128 is also 8-aligned for
    # the sublane dim of `b`, so one size satisfies both constraints.
    bm = _block_size(M, 512 if block_m is None else block_m, 8)
    bk = _block_size(K, 512 if block_k is None else block_k, 128)
    assert M % bm == 0 and K % bk == 0

    grid = (B, M // bm, K // bk)

    in_specs = [pl.BlockSpec((None, bm, bk), lambda bb, i, k: (bb, i, k))]
    args = [a]
    if b.ndim == 2:
        in_specs.append(pl.BlockSpec((bk, N2), lambda bb, i, k: (k, 0)))
    else:
        in_specs.append(pl.BlockSpec((None, bk, N2), lambda bb, i, k: (bb, k, 0)))
    args.append(b)
    if self_add is not None:
        in_specs.append(pl.BlockSpec((None, bm, N2), lambda bb, i, k: (bb, i, 0)))
        args.append(self_add)
    if bias is not None:
        in_specs.append(pl.BlockSpec((1, N2), lambda bb, i, k: (0, 0)))
        args.append(bias.reshape(1, N2).astype(jnp.float32))

    kernel = functools.partial(
        _mm_kernel,
        has_self=self_add is not None,
        has_bias=bias is not None,
        normalize=normalize)

    return pl.pallas_call(
        kernel,
        out_shape=jax.ShapeDtypeStruct((B, M, N2), out_dtype),
        grid=grid,
        in_specs=in_specs,
        out_specs=pl.BlockSpec((None, bm, N2), lambda bb, i, k: (bb, i, 0)),
        scratch_shapes=[pltpu.VMEM((bm, N2), jnp.float32)],
        compiler_params=pltpu.CompilerParams(
            dimension_semantics=("parallel", "parallel", "arbitrary"),
            vmem_limit_bytes=vmem_limit_bytes),
    )(*args)


# ----------------------------------------------------------------------------
# GraphConv forward
# ----------------------------------------------------------------------------
def graph_conv(x, adj, weight, bias=None, *, add_self=False,
               normalize_embedding=False, reorder=None, adj_bf16=False,
               block_n=None, block_k=None):
    """GraphConv forward.

    x: (B, N, Din), adj: (B, N, N), weight: (Din, Dout), bias: (Dout,) or None.
    reorder:  None -> auto (use adj@(xW) when Dout <= Din); True/False forces.
    adj_bf16: feed adjacency to the MXU in bf16 (exact for {0,1} adjacencies,
              halves its HBM traffic); accumulation stays f32.
    Returns (B, N, Dout) float32.
    """
    B, N, Din = x.shape
    Dout = weight.shape[-1]
    if reorder is None:
        reorder = Dout <= Din

    adj_in = adj.astype(jnp.bfloat16) if adj_bf16 else adj

    if reorder:
        # xW once per graph (contraction over Din), then adj @ xW per row tile.
        xw = _fused_matmul(x, weight, block_m=block_n)
        return _fused_matmul(adj_in, xw,
                             self_add=xw if add_self else None,
                             bias=bias, normalize=normalize_embedding,
                             block_m=block_n, block_k=block_k)
    else:
        # Original order (better when Dout > Din): h = adj@x (+x), then h@W.
        h = _fused_matmul(adj_in, x,
                          self_add=x if add_self else None,
                          block_m=block_n, block_k=block_k)
        return _fused_matmul(h, weight, bias=bias,
                             normalize=normalize_embedding, block_m=block_n)


# ----------------------------------------------------------------------------
# Pure-JAX reference (mirrors the PyTorch forward)
# ----------------------------------------------------------------------------
def graph_conv_ref(x, adj, weight, bias=None, *, add_self=False,
                   normalize_embedding=False):
    y = jnp.einsum("bnm,bmd->bnd", adj, x, precision=lax.Precision.HIGHEST)
    if add_self:
        y = y + x
    y = jnp.einsum("bnd,do->bno", y, weight, precision=lax.Precision.HIGHEST)
    if bias is not None:
        y = y + bias
    if normalize_embedding:
        norm = jnp.sqrt(jnp.sum(y * y, axis=2, keepdims=True))
        y = y / jnp.maximum(norm, 1e-12)
    return y


# ----------------------------------------------------------------------------
# Test
# ----------------------------------------------------------------------------
if __name__ == "__main__":
    B, N = 2, 8
    input_dim, output_dim = 16, 32

    key = jax.random.PRNGKey(0)
    kx, kadj, kw, kb = jax.random.split(key, 4)

    x = jax.random.normal(kx, (B, N, input_dim), jnp.float32)
    adj = (jax.random.uniform(kadj, (B, N, N)) > 0.5).astype(jnp.float32)
    adj = jnp.maximum(adj, jnp.eye(N, dtype=jnp.float32)[None])  # self-loops

    bound = (6.0 / (input_dim + output_dim)) ** 0.5
    weight = jax.random.uniform(kw, (input_dim, output_dim), jnp.float32,
                                -bound, bound)
    bias = jax.random.uniform(kb, (output_dim,), jnp.float32, -0.1, 0.1)

    # Config 1: all optional branches on (add_self, bias, normalize); auto order.
    y1 = jax.block_until_ready(
        graph_conv(x, adj, weight, bias,
                   add_self=True, normalize_embedding=True))
    r1 = graph_conv_ref(x, adj, weight, bias,
                        add_self=True, normalize_embedding=True)
    assert y1.shape == (B, N, output_dim), y1.shape
    assert jnp.allclose(y1, r1, rtol=1e-4, atol=1e-4), \
        float(jnp.max(jnp.abs(y1 - r1)))

    # Config 2: default GraphConv (no add_self, no normalize, no bias).
    y2 = jax.block_until_ready(
        graph_conv(x, adj, weight, None,
                   add_self=False, normalize_embedding=False))
    r2 = graph_conv_ref(x, adj, weight, None,
                        add_self=False, normalize_embedding=False)
    assert y2.shape == (B, N, output_dim), y2.shape
    assert jnp.allclose(y2, r2, rtol=1e-4, atol=1e-4), \
        float(jnp.max(jnp.abs(y2 - r2)))

    # Config 3: forced adj@(xW) reorder + bf16 adjacency feed (exact for {0,1}).
    y3 = jax.block_until_ready(
        graph_conv(x, adj, weight, bias,
                   add_self=True, normalize_embedding=True,
                   reorder=True, adj_bf16=True))
    assert y3.shape == (B, N, output_dim), y3.shape
    assert jnp.allclose(y3, r1, rtol=1e-4, atol=1e-4), \
        float(jnp.max(jnp.abs(y3 - r1)))

    print("KERNEL_OK")
</pallas_src>

<mosaic_0001>
module attributes {stable_mosaic.version = 11 : i64} {
  func.func @_mm_kernel(%arg0: i32, %arg1: i32, %arg2: i32, %arg3: memref<1x8x8xf32, #tpu.memory_space<vmem>>, %arg4: memref<1x8x16xf32, #tpu.memory_space<vmem>>, %arg5: memref<1x8x16xf32, #tpu.memory_space<vmem>>, %arg6: memref<1x8x16xf32, #tpu.memory_space<vmem>>, %arg7: memref<8x16xf32, #tpu.memory_space<vmem>>) attributes {dimension_semantics = [#tpu.dimension_semantics<parallel>, #tpu.dimension_semantics<parallel>, #tpu.dimension_semantics<arbitrary>], iteration_bounds = array<i64: 2, 1, 1>, scalar_prefetch = 0 : i64, scratch_operands = 1 : i64, tpu.core_type = #tpu.core_type<tc>, window_params = [{transform_indices = @transform_0, window_bounds = array<i64: 1, 8, 8>}, {transform_indices = @transform_1, window_bounds = array<i64: 1, 8, 16>}, {transform_indices = @transform_2, window_bounds = array<i64: 1, 8, 16>}, {transform_indices = @transform_3, window_bounds = array<i64: 1, 8, 16>}]} {
    %c0_i32 = arith.constant 0 : i32
    %0 = arith.cmpi eq, %arg2, %c0_i32 : i32
    %1 = arith.extui %0 : i1 to i32
    %c0_i32_0 = arith.constant 0 : i32
    %2 = arith.cmpi ne, %1, %c0_i32_0 : i32
    scf.if %2 {
      %cst_12 = arith.constant 0.000000e+00 : f32
      %14 = vector.broadcast %cst_12 : f32 to vector<8x16xf32>
      %c0_13 = arith.constant 0 : index
      %c0_14 = arith.constant 0 : index
      %15 = vector.load %arg7[%c0_13, %c0_14] : memref<8x16xf32, #tpu.memory_space<vmem>>, vector<8x16xf32>
      tpu.vector_store %arg7[%c0_13, %c0_14], %14 {strides = array<i32>} : memref<8x16xf32, #tpu.memory_space<vmem>>, vector<8x16xf32>,
    } else {
    }
    %c0 = arith.constant 0 : index
    %c0_1 = arith.constant 0 : index
    %3 = vector.load %arg7[%c0, %c0_1] : memref<8x16xf32, #tpu.memory_space<vmem>>, vector<8x16xf32>
    %c0_2 = arith.constant 0 : index
    %c0_3 = arith.constant 0 : index
    %c0_4 = arith.constant 0 : index
    %4 = vector.load %arg3[%c0_2, %c0_3, %c0_4] : memref<1x8x8xf32, #tpu.memory_space<vmem>>, vector<1x8x8xf32>
    %5 = vector.shape_cast %4 : vector<1x8x8xf32> to vector<8x8xf32>
    %c0_5 = arith.constant 0 : index
    %c0_6 = arith.constant 0 : index
    %c0_7 = arith.constant 0 : index
    %6 = vector.load %arg4[%c0_5, %c0_6, %c0_7] : memref<1x8x16xf32, #tpu.memory_space<vmem>>, vector<1x8x16xf32>
    %7 = vector.shape_cast %6 : vector<1x8x16xf32> to vector<8x16xf32>
    %cst = arith.constant dense<0.000000e+00> : vector<8x16xf32>
    %8 = tpu.matmul %5, %7, %cst {dimension_numbers = #tpu.dot_dimension_numbers<[1], [0], [0], [1], [0, 0, 1, 1], [], []>} : vector<8x8xf32>, vector<8x16xf32>, vector<8x16xf32> -> vector<8x16xf32>
    %9 = arith.addf %3, %8 : vector<8x16xf32>
    %c0_8 = arith.constant 0 : index
    %c0_9 = arith.constant 0 : index
    %10 = vector.load %arg7[%c0_8, %c0_9] : memref<8x16xf32, #tpu.memory_space<vmem>>, vector<8x16xf32>
    tpu.vector_store %arg7[%c0_8, %c0_9], %9 {strides = array<i32>} : memref<8x16xf32, #tpu.memory_space<vmem>>, vector<8x16xf32>,
    %c0_i32_10 = arith.constant 0 : i32
    %11 = arith.cmpi eq, %arg2, %c0_i32_10 : i32
    %12 = arith.extui %11 : i1 to i32
    %c0_i32_11 = arith.constant 0 : i32
    %13 = arith.cmpi ne, %12, %c0_i32_11 : i32
    scf.if %13 {
      %c0_12 = arith.constant 0 : index
      %c0_13 = arith.constant 0 : index
      %14 = vector.load %arg7[%c0_12, %c0_13] : memref<8x16xf32, #tpu.memory_space<vmem>>, vector<8x16xf32>
      %c0_14 = arith.constant 0 : index
      %c0_15 = arith.constant 0 : index
      %c0_16 = arith.constant 0 : index
      %15 = vector.load %arg5[%c0_14, %c0_15, %c0_16] : memref<1x8x16xf32, #tpu.memory_space<vmem>>, vector<1x8x16xf32>
      %16 = vector.shape_cast %15 : vector<1x8x16xf32> to vector<8x16xf32>
      %17 = arith.addf %14, %16 : vector<8x16xf32>
      %c0_17 = arith.constant 0 : index
      %c0_18 = arith.constant 0 : index
      %c0_19 = arith.constant 0 : index
      %18 = vector.load %arg6[%c0_17, %c0_18, %c0_19] : memref<1x8x16xf32, #tpu.memory_space<vmem>>, vector<1x8x16xf32>
      %19 = vector.shape_cast %18 : vector<1x8x16xf32> to vector<8x16xf32>
      %20 = vector.shape_cast %17 : vector<8x16xf32> to vector<1x8x16xf32>
      tpu.vector_store %arg6[%c0_17, %c0_18, %c0_19], %20 {strides = array<i32>} : memref<1x8x16xf32, #tpu.memory_space<vmem>>, vector<1x8x16xf32>,
    } else {
    }
    return
  }
  func.func @transform_0(%arg0: i32, %arg1: i32, %arg2: i32) -> (i32, i32, i32) {
    %c0_i32 = arith.constant 0 : i32
    return %arg0, %arg1, %arg2 : i32, i32, i32
  }
  func.func @transform_1(%arg0: i32, %arg1: i32, %arg2: i32) -> (i32, i32, i32) {
    %c0_i32 = arith.constant 0 : i32
    %c0_i32_0 = arith.constant 0 : i32
    return %arg0, %arg2, %c0_i32 : i32, i32, i32
  }
  func.func @transform_2(%arg0: i32, %arg1: i32, %arg2: i32) -> (i32, i32, i32) {
    %c0_i32 = arith.constant 0 : i32
    %c0_i32_0 = arith.constant 0 : i32
    return %arg0, %arg1, %c0_i32 : i32, i32, i32
  }
  func.func @transform_3(%arg0: i32, %arg1: i32, %arg2: i32) -> (i32, i32, i32) {
    %c0_i32 = arith.constant 0 : i32
    %c0_i32_0 = arith.constant 0 : i32
    return %arg0, %arg1, %c0_i32 : i32, i32, i32
  }
}

</mosaic_0001>

<bundles_post_ra>
// kernel: tpu_custom_call.1
= control target key start
LH: loop header
LB: loop body
LE: loop exit
PB: predicated region body
PF: predicated region fallthrough
CT: control target
= control target key end

     0   :  { %s1025_s0 = inlined_call_operand.hbm [shape: f32[2,8,8], index: 0, kind: input, shape index: {}]   ;;  %s1026_s1 = inlined_call_operand.hbm [shape: f32[2,8,16], index: 1, kind: input, shape index: {}]   ;;  %s1027_s2 = inlined_call_operand.hbm [shape: f32[2,8,16], index: 2, kind: input, shape index: {}]   ;;  %s1028_s3 = inlined_call_operand.hbm [shape: f32[2,8,16], index: 3, kind: output, shape index: {}]  }
   0x1   :  { %1032 = sst [smem:[#allocation15_spill]] %s1026_s1 }
   0x2   :  { %8 = vsyncpa [#allocation4], 0 }
   0x3   :  { %10 = vsyncpa [#allocation4 + $0x1], 0 }
   0x4   :  { %11 = vsyncpa [#allocation7], 0 }
   0x5   :  { %13 = vsyncpa [#allocation7 + $0x1], 0 }
   0x6   :  { %14 = vsyncpa [#allocation5], 0 }
   0x7   :  { %16 = vsyncpa [#allocation5 + $0x1], 0  ;;  %s824_s12 = smov 0   ;;  %s826_s13 = smov 0  }
   0x8   :  { %s828_s14 = smov 0   ;;  %s830_s15 = smov 0  }
   0x9   :  { %s832_s16 = smov 0   ;;  %s834_s17 = smov 0  }
   0xa LB: > { %1033 = sst [smem:[#allocation13_spill]] %s792_s16  ;;  %s855_s18 = sadd.s32 4294967295, %s796_s17   ;;  %s796_s17 = sphi %s834_s17, %s22_s17   ;;  %s792_s16 = sphi %s832_s16, %s1045_s16   ;;  %s788_s15 = sphi %s830_s15, %s1044_s15   ;;  %s784_s14 = sphi %s828_s14, %s1048_s14   ;;  %s780_s13 = sphi %s826_s13, %s1047_s13   ;;  %s776_s12 = sphi %s824_s12, %s1046_s12  }
   0xb   : > { %s528_s19 = sadd.s32 4294967294, %s796_s17   ;;  %s41_s20 = sadd.s32 1, %s792_s16 }
   0xc   : > { %s52_s21 = sadd.s32 1, %s784_s14  ;;  %p43_p0 = scmp.ge.s32.totalorder %s41_s20, 2 }
   0xd   : > { %p59_p1 = scmp.ne.s32.totalorder %s784_s14, %s780_s13  ;;  %p60_p2 = scmp.eq.s32.totalorder %s796_s17, 0 }
   0xe   : > { %p65_p3 = scmp.ne.s32.totalorder %s780_s13, %s776_s12  ;;  %s1050_s20 = smov (%p43_p0, %s41_s20), 0 }
   0xf   : > { %1034 = sst [smem:[#allocation14_spill]] %s1050_s20  ;;  %p867_p4 = por %p60_p2, %p59_p1 }
  0x10   : > { %p66_p5 = scmp.eq.s32.totalorder %s855_s18, 0  ;;  %s45_s23 = ssub.s32 %s792_s16, %s1050_s20 }
  0x11   : > { %p147_p6 = scmp.eq.s32.totalorder %s855_s18, 1  ;;  %p50_p7 = scmp.eq.s32.totalorder %s45_s23, 0 }
  0x12   : > { %p875_p8 = por %p66_p5, %p65_p3  ;;  %p153_p10 = scmp.eq.s32.totalorder %s528_s19, 1 }
  0x13   : > { %p879_p9 = por %p147_p6, %p59_p1  ;;  %p576_p13 = scmp.lt.s32.totalorder %s796_s17, 2 }
  0x14   : > { %s884_s26 = scalar_select %p50_p7, %s784_s14, %s52_s21  }
  0x15   : > { %p886_p11 = por %p153_p10, %p65_p3  ;;  %s1029_s28 = sand.u32 1, %s784_s14  }
  0x16   : > { %s895_s29 = sshll.u32 %s1029_s28, 3  ;;  %s898_s30 = sshll.u32 %s792_s16, 7 }
  0x17   : > { %p902_p0 = pnand %p576_p13, %p867_p4  ;;  %s193_s5 = sand.u32 1, %s796_s17  }
  0x18   : > { %s1040_s1 = sld [smem:[#allocation15_spill]]  ;;  %s197_s9 = scalar_lea.vmem [#allocation6], %s895_s29 }
  0x19   : > { %s205_s10 = sshll.u32 %s197_s9, 4  ;;  %p537_p1 = scmp.ge.s32.totalorder %s796_s17, 1  ;;  %s206_s10 = int_to_ptr.vmem [resolvable:$true] %s205_s10 }
  0x1a   : > { %p229_p2 = scmp.lt.s32.totalorder %s796_s17, 3  ;;  %s914_s11 = scalar_lea.sflag [#allocation7], %s193_s5 }
  0x1b   : > { %p630_p3 = pneg %p902_p0  ;;  %s641_s19 = scalar_lea.vmem %s206_s10, 128 }
  0x1c   : > { %p642_p4 = scmp.ne.s32.totalorder %s206_s10, %s641_s19  ;;  %s798_s21 = smov [#allocation6]  }
  0x1d   : > { %s646_s22 = sshll.u32 %s798_s21, 4  ;;  %s647_s22 = int_to_ptr.vmem [resolvable:$false] %s646_s22 }
  0x1e   : > { %s203_s8 = scalar_lea.hbm %s1040_s1, %s898_s30  ;;  %p644_p5 = pnand %p642_p4, %p630_p3 }
  0x1f   : > { %s648_s23 = scalar_lea.vmem %s647_s22, 256  ;;  %p649_p7 = scmp.lt.s32.totalorder %s206_s10, %s647_s22 }
  0x20   : > { %p645_p6 = pneg %p644_p5  ;;  %p650_p10 = scmp.lt.s32.totalorder %s648_s23, %s641_s19 }
  0x22   : > { %p651_p13 = por %p650_p10, %p649_p7 }
  0x24   : > { %p652_p12 = pnand %p651_p13, %p645_p6 }
  0x26   : > { %655 = shalt.err (!%p652_p12)
}
  0x27   : > { %568 = dma.hbm_to_vmem [thread:$0]  (!%p902_p0), %s203_s8, 128, %s206_s10, %s914_s11  }
  0x28   : > { %p928_p4 = pnand %p537_p1, %p229_p2  ;;  %s184_s9 = scalar_lea.hbm %s1025_s0, %s898_s30 }
  0x29   : > { %s177_s19 = scalar_lea.vmem [#allocation3], %s895_s29  ;;  %s222_s28 = scalar_lea.hbm %s1027_s2, %s898_s30 }
  0x2a   : > { %s186_s21 = sshll.u32 %s177_s19, 4  ;;  %s1042_s1 = sand.u32 1, %s784_s14   ;;  %s187_s21 = int_to_ptr.vmem [resolvable:$true] %s186_s21 }
  0x2b   : > { %s174_s20 = scalar_lea.sflag [#allocation4], %s1042_s1  ;;  %s669_s8 = scalar_lea.vmem %s187_s21, 128 }
  0x2c   : > { %p670_p12 = scmp.ne.s32.totalorder %s187_s21, %s669_s8  ;;  %s799_s10 = smov [#allocation3]  }
  0x2d   : > { %s674_s16 = sshll.u32 %s799_s10, 4  ;;  %s675_s16 = int_to_ptr.vmem [resolvable:$false] %s674_s16 }
  0x2e   : > { %p672_p1 = pnand %p670_p12, %p630_p3  ;;  %s676_s6 = scalar_lea.vmem %s675_s16, 256 }
  0x2f   : > { %p677_p5 = scmp.lt.s32.totalorder %s187_s21, %s675_s16  ;;  %p678_p6 = scmp.lt.s32.totalorder %s676_s6, %s669_s8 }
  0x30   : > { %p673_p2 = pneg %p672_p1 }
  0x31   : > { %p679_p7 = por %p678_p6, %p677_p5 }
  0x33   : > { %p680_p10 = pnand %p679_p7, %p673_p2 }
  0x35   : > { %683 = shalt.err (!%p680_p10)
}
  0x36   : > { %565 = dma.hbm_to_vmem [thread:$0]  (!%p902_p0), %s184_s9, 128, %s187_s21, %s174_s20  }
  0x37   : > { %s216_s1 = scalar_lea.vmem [#allocation8], %s895_s29  ;;  %s800_s22 = smov [#allocation8]  }
  0x38   : > { %s224_s7 = sshll.u32 %s216_s1, 4  ;;  %s702_s16 = sshll.u32 %s800_s22, 4  ;;  %s225_s7 = int_to_ptr.vmem [resolvable:$true] %s224_s7  ;;  %s703_s16 = int_to_ptr.vmem [resolvable:$false] %s702_s16 }
  0x39   : > { %s697_s19 = scalar_lea.vmem %s225_s7, 128  ;;  %s704_s23 = scalar_lea.vmem %s703_s16, 256 }
  0x3a   : > { %p698_p13 = scmp.ne.s32.totalorder %s225_s7, %s697_s19  ;;  %p705_p2 = scmp.lt.s32.totalorder %s225_s7, %s703_s16 }
  0x3b   : > { %p706_p5 = scmp.lt.s32.totalorder %s704_s23, %s697_s19 }
  0x3c   : > { %p700_p12 = pnand %p698_p13, %p630_p3 }
  0x3d   : > { %p707_p6 = por %p706_p5, %p705_p2 }
  0x3e   : > { %p701_p1 = pneg %p700_p12 }
  0x40   : > { %p708_p7 = pnand %p707_p6, %p701_p1 }
  0x42   : > { %711 = shalt.err (!%p708_p7)
}
  0x43   : > { %571 = dma.hbm_to_vmem [thread:$0]  (!%p902_p0), %s222_s28, 128, %s225_s7, %s914_s11  }
  0x44   : > { %233 = sbr.rel (%p928_p4) target bundleno = 298 (0x12a), region = 32  ;;  %s963_s9 = sand.u32 (!%p928_p4), 1, %s780_s13  }
  0x45   : > { %s966_s21 = sshll.u32 (!%p928_p4), %s963_s9, 3  ;;  %s236_s4 = scalar_lea.sflag (!%p928_p4), [#allocation4], %s963_s9 }
  0x46   : > { %s239_s8 = scalar_lea.vmem (!%p928_p4), [#allocation3], %s966_s21 }
  0x49   : > { %763 = dma.done.wait (%p875_p8), %s236_s4, 128  }
  0x4a   : > { %765 = vsyncadd (%p875_p8), %s236_s4, 4294967168  ;;  %s244_s28 = sand.u32 1, %s855_s18   ;;  %s248_s11 = scalar_lea.vmem [#allocation6], %s966_s21 }
  0x4b   : > { %s245_s30 = scalar_lea.sflag [#allocation7], %s244_s28 }
  0x4c   : > { %767 = dma.done.wait (%p875_p8), %s245_s30, 256  }
  0x4d   : > { %769 = vsyncadd (%p875_p8), %s245_s30, 4294967040  ;;  %vm294_vm0 = vcmask 130048   ;;  %v801_v0 = vmov 0.0   ;;  %vm802_vm1 = vmmov 0   ;;  %vm299_vm2 = vcmask 64512   ;;  %v298_v1 = vld [vmem:[%s248_s11] sm:$0xff] }
  0x4e   : > { %295 = vst.msk [vmem:[#allocation2] sm:$0xff] %vm294_vm0, %v801_v0  ;;  %549 = vmatprep.subr.mxu0 %v801_v0  ;;  %551 = vmatprep.mubr.msk.f32.mxu0 %vm802_vm1, %v801_v0  ;;  %v297_v2 = vld [vmem:[%s239_s8] sm:$0xff]  ;;  %s257_s18 = scalar_lea.vmem [#allocation8], %s966_s21  ;;  %s544_s24 = sshll.u32 %s788_s15, 7 }
  0x4f   : > { %550 = vmatpush3.msra.mxu0 %v298_v1  ;;  %v380_v7 = vld [vmem:[%s257_s18] sm:$0xff]  ;;  %s289_s5 = scalar_lea.vmem [#allocation9], %s966_s21  ;;  %s396_s7 = scalar_lea.hbm %s1028_s3, %s544_s24 }
  0x50   : > { %552 = vmatmul.mubr.msk.f32.vlgmr.msra.gmra.mxu0 %vm299_vm2, %v297_v2  ;;  %s398_s10 = sshll.u32 %s289_s5, 4  ;;  %s384_s19 = scalar_lea.sflag [#allocation5], %s963_s9  ;;  %s399_s10 = int_to_ptr.vmem [resolvable:$true] %s398_s10 }
  0x51   : > { %s712_s22 = scalar_lea.vmem %s399_s10, 128  ;;  %s803_s16 = smov [#allocation9]  }
  0x52   : > { %p713_p8 = scmp.ne.s32.totalorder %s399_s10, %s712_s22  ;;  %s716_s23 = sshll.u32 %s803_s16, 4  ;;  %s717_s23 = int_to_ptr.vmem [resolvable:$false] %s716_s23 }
  0x53   : > { %s718_s15 = scalar_lea.vmem %s717_s23, 256  ;;  %p719_p4 = scmp.lt.s32.totalorder %s399_s10, %s717_s23 }
  0x54   : > { %p714_p0 = pnand %p713_p8, %p879_p9  ;;  %p720_p10 = scmp.lt.s32.totalorder %s718_s15, %s712_s22 }
  0x55   : > { %v296_v3 = vld [vmem:[#allocation2] sm:$0xff] }
  0x56   : > { %p715_p3 = pneg %p714_p0  ;;  %p721_p13 = por %p720_p10, %p719_p4 }
  0x58   : > { %p722_p12 = pnand %p721_p13, %p715_p3 }
 0x110   : > { %v369_v4 = vpop.f32.mrf.mxu0 }
 0x111   : > { %v373_v5 = vadd.f32 %v369_v4, %v296_v3 }
 0x112   : > { %v553_v6 = vpop.f32.mrf.mxu0 }
 0x113   : > { %375 = vst.msk [vmem:[#allocation2] sm:$0xff] %vm294_vm0, %v373_v5 }
 0x11a   : > { %v379_v8 = vld [vmem:[#allocation2] sm:$0xff] }
 0x11b   : > { %v381_v9 = vadd.f32 %v380_v7, %v379_v8 }
 0x11d   : > { %382 = vst.msk [vmem:[%s289_s5] sm:$0xff] %vm294_vm0, %v381_v9 }
 0x11e   : > { %725 = shalt.err (!%p722_p12)
}
 0x11f   : > { %s726_s20 = scalar_lea.hbm %s396_s7, 128  ;;  %s730_s21 = scalar_lea.hbm %s1028_s3, 256 }
 0x120   : > { %p727_p1 = scmp.ne.s32.totalorder %s396_s7, %s726_s20  ;;  %p731_p6 = scmp.lt.s32.totalorder %s396_s7, %s1028_s3 }
 0x121   : > { %p732_p7 = scmp.lt.s32.totalorder %s730_s21, %s726_s20 }
 0x122   : > { %p728_p2 = pnand %p727_p1, %p879_p9 }
 0x123   : > { %p733_p8 = por %p732_p7, %p731_p6 }
 0x124   : > { %p729_p5 = pneg %p728_p2 }
 0x126   : > { %p734_p0 = pnand %p733_p8, %p729_p5 }
 0x128   : > { %737 = shalt.err (!%p734_p0)
}
 0x129   : > { %560 = dma.vmem_to_hbm [thread:$0]  (%p879_p9), %s399_s10, 128, %s396_s7, %s384_s19  }
 0x12a PF: > { %s410_s28 = sand.u32 1, %s776_s12   ;;  %p1043_p3 = scmp.ge.s32.totalorder %s796_s17, 2 }
 0x12b   : > { %s411_s30 = scalar_lea.sflag [#allocation5], %s410_s28 }
 0x12c   : > { %p573_p4 = pnand %p1043_p3, %p886_p11 }
 0x12e   : > { %p574_p10 = pneg %p573_p4 }
 0x130   : > { %771 = dma.done.wait (%p574_p10), %s411_s30, 128  }
 0x131   : > { %773 = vsyncadd (%p574_p10), %s411_s30, 4294967168  ;;  %s22_s17 = sadd.s32 1, %s796_s17   ;;  %s1044_s15 = sld [smem:[#allocation13_spill]] }
 0x132   : > { %p19_p13 = scmp.ge.s32.totalorder %s22_s17, 4   ;;  %s1045_s16 = sld [smem:[#allocation14_spill]] }
 0x133   : > { %s1046_s12 = smov %s780_s13  ;;  %s1047_s13 = smov %s784_s14 }
 0x134   : > { %s1048_s14 = smov %s884_s26  ;;  %21 = sbr.rel (!%p19_p13) target bundleno = 10 (0xa), region = 109 }
 0x139   :  { %416 = vsyncpa [#allocation4], 1 }
 0x13a   :  { %418 = vsyncpa [#allocation4 + $0x1], 1 }
 0x13b   :  { %419 = vsyncpa [#allocation7], 1 }
 0x13c   :  { %421 = vsyncpa [#allocation7 + $0x1], 1 }
 0x13d   :  { %422 = vsyncpa [#allocation5], 1 }
 0x13e   :  { %424 = vsyncpa [#allocation5 + $0x1], 1 }

</bundles_post_ra>
